<compile_context>
chip_gen: v5e
topology: v5e:2x2
jax: 0.10.0
libtpu: 0.0.40
codegen_flags: <defaults>
</compile_context>

<pallas_src>
import math
import functools

import jax
import jax.numpy as jnp
from jax.experimental import pallas as pl
from jax.experimental.pallas import tpu as pltpu


def _finalize(y_f32, b_f32, *, scale, activation, negative_slope):
    """Epilogue applied once to the f32 accumulator."""
    y = y_f32 * scale
    if activation:
        # ScaledLeakyReLU: leaky_relu(y, slope) * sqrt(2); bias is unused.
        y = jnp.where(y >= 0.0, y, y * negative_slope) * math.sqrt(2.0)
    else:
        # bias already pre-multiplied by lr_mul on the host.
        y = y + b_f32
    return y


def _equal_linear_kernel_acc(x_ref, w_ref, b_ref, o_ref, acc_ref, *,
                             scale, activation, negative_slope):
    """General path: K tiled over grid axis 2 with an f32 accumulator.

    x_ref : (tm, tk)  activation tile              (VMEM)
    w_ref : (tk, tn)  transposed weight tile       (VMEM)
    b_ref : (1,  tn)  f32 bias*lr_mul tile         (VMEM)
    o_ref : (tm, tn)  output tile                  (VMEM)
    acc_ref:(tm, tn)  f32 accumulator              (VMEM scratch)
    """
    k = pl.program_id(2)

    @pl.when(k == 0)
    def _():
        acc_ref[...] = jnp.zeros_like(acc_ref)

    acc_ref[...] += jnp.dot(x_ref[...], w_ref[...],
                            preferred_element_type=jnp.float32)

    @pl.when(k == pl.num_programs(2) - 1)
    def _():
        y = _finalize(acc_ref[...], b_ref[...], scale=scale,
                      activation=activation, negative_slope=negative_slope)
        o_ref[...] = y.astype(o_ref.dtype)


def _equal_linear_kernel_single(x_ref, w_ref, b_ref, o_ref, *,
                                scale, activation, negative_slope):
    """Fast path: whole K in one tile — no scratch, no init/finalize gating."""
    y = jnp.dot(x_ref[...], w_ref[...], preferred_element_type=jnp.float32)
    y = _finalize(y, b_ref[...], scale=scale,
                  activation=activation, negative_slope=negative_slope)
    o_ref[...] = y.astype(o_ref.dtype)


def _round_up(v, m):
    return (v + m - 1) // m * m


def equal_linear(x, weight, bias=None, *, lr_mul=1.0, activation=None,
                 negative_slope=0.2, compute_dtype=None,
                 tm_max=512, tn_max=512, tk_max=512):
    """EqualLinear forward.

    x      : (..., in_dim)
    weight : (out_dim, in_dim)   -- raw parameter (randn / lr_mul)
    bias   : (out_dim,) or None  -- raw parameter (ignored if activation set)
    """
    out_dim, in_dim = weight.shape
    assert x.shape[-1] == in_dim
    scale = (1.0 / math.sqrt(in_dim)) * float(lr_mul)
    use_act = bool(activation)

    lead = x.shape[:-1]
    M = 1
    for d in lead:
        M *= d
    x2 = x.reshape(M, in_dim)

    # Tile sizes: biggest that fits, (8, 128)-aligned; small dims become a
    # single lane-dense tile (padded to 128 so stores are unmasked).
    tm = tm_max if M >= tm_max else _round_up(max(M, 1), 8)
    tn = tn_max if out_dim >= tn_max else _round_up(out_dim, 128)
    tk = tk_max if in_dim >= tk_max else _round_up(in_dim, 128)
    Mp = _round_up(M, tm)
    Np = _round_up(out_dim, tn)
    Kp = _round_up(in_dim, tk)

    in_dtype = compute_dtype if compute_dtype is not None else x.dtype
    # Zero-pad: zeros along K do not change the matmul; padded M rows / N cols
    # are sliced away afterwards.
    xp = jnp.pad(x2, ((0, Mp - M), (0, Kp - in_dim))).astype(in_dtype)
    wT = jnp.pad(jnp.transpose(weight, (1, 0)),
                 ((0, Kp - in_dim), (0, Np - out_dim))).astype(in_dtype)
    if bias is None or use_act:
        bp = jnp.zeros((1, Np), jnp.float32)
    else:
        # Fold lr_mul into the bias once, on the host (not per output tile).
        bp = jnp.pad((bias.astype(jnp.float32) * float(lr_mul)
                      ).reshape(1, out_dim),
                     ((0, 0), (0, Np - out_dim)))

    kt = Kp // tk
    if kt == 1:
        # Single-K fast path: 2-D grid, no accumulator scratch.
        kernel = functools.partial(
            _equal_linear_kernel_single,
            scale=scale, activation=use_act,
            negative_slope=float(negative_slope))
        grid_spec = pltpu.PrefetchScalarGridSpec(
            num_scalar_prefetch=0,
            grid=(Mp // tm, Np // tn),
            in_specs=[
                pl.BlockSpec((tm, tk), lambda i, j: (i, 0)),
                pl.BlockSpec((tk, tn), lambda i, j: (0, j)),
                pl.BlockSpec((1, tn), lambda i, j: (0, j)),
            ],
            out_specs=pl.BlockSpec((tm, tn), lambda i, j: (i, j)),
            scratch_shapes=[],
        )
        dim_sem = ("parallel", "parallel")
    else:
        kernel = functools.partial(
            _equal_linear_kernel_acc,
            scale=scale, activation=use_act,
            negative_slope=float(negative_slope))
        grid_spec = pltpu.PrefetchScalarGridSpec(
            num_scalar_prefetch=0,
            grid=(Mp // tm, Np // tn, kt),
            in_specs=[
                pl.BlockSpec((tm, tk), lambda i, j, k: (i, k)),
                pl.BlockSpec((tk, tn), lambda i, j, k: (k, j)),
                pl.BlockSpec((1, tn), lambda i, j, k: (0, j)),
            ],
            out_specs=pl.BlockSpec((tm, tn), lambda i, j, k: (i, j)),
            scratch_shapes=[pltpu.VMEM((tm, tn), jnp.float32)],
        )
        dim_sem = ("parallel", "parallel", "arbitrary")

    out = pl.pallas_call(
        kernel,
        out_shape=jax.ShapeDtypeStruct((Mp, Np), x.dtype),
        grid_spec=grid_spec,
        compiler_params=pltpu.CompilerParams(
            dimension_semantics=dim_sem),
    )(xp, wT, bp)

    out = out[:M, :out_dim]
    return out.reshape(lead + (out_dim,))


if __name__ == "__main__":
    key = jax.random.PRNGKey(0)
    k1, k2, k3 = jax.random.split(key, 3)

    # Small shapes implied by EqualLinear: batch=2, seq=8, in_dim=out_dim=32.
    batch, seq, in_dim, out_dim = 2, 8, 32, 32
    x = jax.random.normal(k1, (batch, seq, in_dim), dtype=jnp.float32)

    # --- Case 1: plain EqualLinear (bias path), lr_mul = 1 -------------------
    lr_mul = 1.0
    weight = jax.random.normal(k2, (out_dim, in_dim), dtype=jnp.float32) / lr_mul
    bias = jnp.full((out_dim,), 0.1, jnp.float32)          # bias_init = 0.1

    out = equal_linear(x, weight, bias, lr_mul=lr_mul, activation=None)
    out = jax.block_until_ready(out)

    scale = 1.0 / math.sqrt(in_dim) * lr_mul
    ref = jnp.einsum("bsi,oi->bso", x, weight * scale) + bias * lr_mul
    assert out.shape == ref.shape == (batch, seq, out_dim)
    assert jnp.allclose(out, ref, atol=1e-4, rtol=1e-4)

    # --- Case 2: activation='scaled_leakyrelu', lr_mul = 0.01 (mapping net) --
    lr_mul2 = 0.01
    weight2 = jax.random.normal(k3, (out_dim, in_dim), dtype=jnp.float32) / lr_mul2

    out2 = equal_linear(x, weight2, None, lr_mul=lr_mul2,
                        activation="scaled_leakyrelu")
    out2 = jax.block_until_ready(out2)

    scale2 = 1.0 / math.sqrt(in_dim) * lr_mul2
    y = jnp.einsum("bsi,oi->bso", x, weight2 * scale2)
    ref2 = jnp.where(y >= 0, y, 0.2 * y) * math.sqrt(2.0)
    assert jnp.allclose(out2, ref2, atol=1e-4, rtol=1e-4)

    # --- Case 3: larger shape exercising the K-reduction (scratch) path ------
    M3, K3, N3 = 640, 1024, 768
    x3 = jax.random.normal(k1, (M3, K3), dtype=jnp.float32)
    w3 = jax.random.normal(k2, (N3, K3), dtype=jnp.float32)
    b3 = jax.random.normal(k3, (N3,), dtype=jnp.float32)
    out3 = jax.block_until_ready(equal_linear(x3, w3, b3, lr_mul=1.0))
    scale3 = 1.0 / math.sqrt(K3)
    ref3 = x3 @ (w3 * scale3).T + b3
    assert jnp.allclose(out3, ref3, atol=2e-3, rtol=2e-3)

    print("KERNEL_OK")
</pallas_src>

<mosaic_0001>
module attributes {stable_mosaic.version = 11 : i64} {
  func.func @_equal_linear_kernel_single(%arg0: i32, %arg1: i32, %arg2: memref<16x128xf32, #tpu.memory_space<vmem>>, %arg3: memref<128x128xf32, #tpu.memory_space<vmem>>, %arg4: memref<1x128xf32, #tpu.memory_space<vmem>>, %arg5: memref<16x128xf32, #tpu.memory_space<vmem>>) attributes {dimension_semantics = [#tpu.dimension_semantics<parallel>, #tpu.dimension_semantics<parallel>], iteration_bounds = array<i64: 1, 1>, scalar_prefetch = 0 : i64, scratch_operands = 0 : i64, tpu.core_type = #tpu.core_type<tc>, window_params = [{transform_indices = @transform_0, window_bounds = array<i64: 16, 128>}, {transform_indices = @transform_1, window_bounds = array<i64: 128, 128>}, {transform_indices = @transform_2, window_bounds = array<i64: 1, 128>}, {transform_indices = @transform_3, window_bounds = array<i64: 16, 128>}]} {
    %c0 = arith.constant 0 : index
    %c0_0 = arith.constant 0 : index
    %0 = vector.load %arg2[%c0, %c0_0] : memref<16x128xf32, #tpu.memory_space<vmem>>, vector<16x128xf32>
    %c0_1 = arith.constant 0 : index
    %c0_2 = arith.constant 0 : index
    %1 = vector.load %arg3[%c0_1, %c0_2] : memref<128x128xf32, #tpu.memory_space<vmem>>, vector<128x128xf32>
    %cst = arith.constant dense<0.000000e+00> : vector<16x128xf32>
    %2 = tpu.matmul %0, %1, %cst {dimension_numbers = #tpu.dot_dimension_numbers<[1], [0], [0], [1], [0, 0, 1, 1], [], []>} : vector<16x128xf32>, vector<128x128xf32>, vector<16x128xf32> -> vector<16x128xf32>
    %c0_3 = arith.constant 0 : index
    %c0_4 = arith.constant 0 : index
    %3 = vector.load %arg4[%c0_3, %c0_4] : memref<1x128xf32, #tpu.memory_space<vmem>>, vector<1x128xf32>
    %cst_5 = arith.constant 0.176776692 : f32
    %4 = vector.broadcast %cst_5 : f32 to vector<16x128xf32>
    %5 = arith.mulf %2, %4 : vector<16x128xf32>
    %6 = vector.broadcast %3 : vector<1x128xf32> to vector<16x128xf32>
    %7 = arith.addf %5, %6 : vector<16x128xf32>
    %c0_6 = arith.constant 0 : index
    %c0_7 = arith.constant 0 : index
    %8 = vector.load %arg5[%c0_6, %c0_7] : memref<16x128xf32, #tpu.memory_space<vmem>>, vector<16x128xf32>
    tpu.vector_store %arg5[%c0_6, %c0_7], %7 {strides = array<i32>} : memref<16x128xf32, #tpu.memory_space<vmem>>, vector<16x128xf32>,
    return
  }
  func.func @transform_0(%arg0: i32, %arg1: i32) -> (i32, i32) {
    %c0_i32 = arith.constant 0 : i32
    %c0_i32_0 = arith.constant 0 : i32
    return %arg0, %c0_i32 : i32, i32
  }
  func.func @transform_1(%arg0: i32, %arg1: i32) -> (i32, i32) {
    %c0_i32 = arith.constant 0 : i32
    %c0_i32_0 = arith.constant 0 : i32
    return %c0_i32, %arg1 : i32, i32
  }
  func.func @transform_2(%arg0: i32, %arg1: i32) -> (i32, i32) {
    %c0_i32 = arith.constant 0 : i32
    %c0_i32_0 = arith.constant 0 : i32
    return %c0_i32, %arg1 : i32, i32
  }
  func.func @transform_3(%arg0: i32, %arg1: i32) -> (i32, i32) {
    %c0_i32 = arith.constant 0 : i32
    return %arg0, %arg1 : i32, i32
  }
}

</mosaic_0001>

<bundles_post_ra>
// kernel: tpu_custom_call.1
= control target key start
LH: loop header
LB: loop body
LE: loop exit
PB: predicated region body
PF: predicated region fallthrough
CT: control target
= control target key end

     0   :  { %8 = vsyncpa [#allocation3], 0  ;;  %s264_s0 = inlined_call_operand.hbm [shape: f32[16,128], index: 0, kind: input, shape index: {}]   ;;  %s265_s1 = inlined_call_operand.hbm [shape: f32[128,128], index: 1, kind: input, shape index: {}]   ;;  %s266_s2 = inlined_call_operand.vmem [shape: f32[1,128], index: 2, kind: input, shape index: {}]   ;;  %s267_s3 = inlined_call_operand.hbm [shape: f32[16,128], index: 3, kind: output, shape index: {}]  }
   0x1   :  { %9 = vsyncpa [#allocation6], 0 }
   0x2   :  { %10 = vsyncpa [#allocation4], 0  ;;  %s15_s14 = sshll.u32 %s264_s0, 4  ;;  %s218_s15 = smov [#allocation2]   ;;  %s16_s14 = int_to_ptr.hbm [resolvable:$true] %s15_s14 }
   0x3   :  { %s17_s16 = sshll.u32 %s218_s15, 4  ;;  %s28_s19 = sshll.u32 %s265_s1, 4  ;;  %s18_s16 = int_to_ptr.vmem [resolvable:$true] %s17_s16  ;;  %s29_s19 = int_to_ptr.hbm [resolvable:$true] %s28_s19 }
   0x4   :  { %s219_s20 = smov 128   ;;  %s220_s21 = smov 8  }
   0x5   :  { %23 = dma.hbm_to_vmem [thread:$0]  %s16_s14, 256, %s18_s16, [#allocation3], %s219_s20, %s219_s20, %s220_s21  }
   0x6   :  { %s221_s22 = smov [#allocation5]  }
   0x7   :  { %s30_s23 = sshll.u32 %s221_s22, 4  ;;  %s31_s23 = int_to_ptr.vmem [resolvable:$true] %s30_s23 }
   0x8   :  { %36 = dma.hbm_to_vmem [thread:$0]  %s29_s19, 2048, %s31_s23, [#allocation6], %s219_s20, %s219_s20, %s220_s21  }
   0x9   :  { %212 = dma.done.wait [#allocation3], 256  }
   0xa   :  { %213 = vsyncadd [#allocation3], 4294967040 }
   0xb   :  { %214 = dma.done.wait [#allocation6], 2048  }
   0xc   :  { %215 = vsyncadd [#allocation6], 4294965248  ;;  %v64_v0 = vld [vmem:[#allocation5 + $0x78] sm:$0xff]  ;;  %v63_v1 = vld [vmem:[#allocation5 + $0x70] sm:$0xff]  ;;  %s222_s24 = smov [#allocation7]   ;;  %s104_s28 = sshll.u32 %s267_s3, 4  ;;  %s105_s28 = int_to_ptr.hbm [resolvable:$true] %s104_s28 }
   0xd   :  { %65 = vmatpush.msra.mxu0 %v64_v0  ;;  %118 = vmatpush.msra.mxu1 %v64_v0  ;;  %v62_v2 = vld [vmem:[#allocation5 + $0x68] sm:$0xff]  ;;  %v61_v3 = vld [vmem:[#allocation5 + $0x60] sm:$0xff]  ;;  %v60_v4 = vld [vmem:[#allocation5 + $0x58] sm:$0xff]  ;;  %s102_s25 = sshll.u32 %s222_s24, 4  ;;  %s103_s25 = int_to_ptr.vmem [resolvable:$true] %s102_s25 }
   0xe   :  { %v59_v5 = vld [vmem:[#allocation5 + $0x50] sm:$0xff]  ;;  %v58_v6 = vld [vmem:[#allocation5 + $0x48] sm:$0xff]  ;;  %v57_v7 = vld [vmem:[#allocation5 + $0x40] sm:$0xff] }
   0xf   :  { %66 = vmatpush.msra.mxu0 %v63_v1  ;;  %119 = vmatpush.msra.mxu1 %v63_v1  ;;  %v56_v8 = vld [vmem:[#allocation5 + $0x38] sm:$0xff]  ;;  %v55_v9 = vld [vmem:[#allocation5 + $0x30] sm:$0xff]  ;;  %v54_v10 = vld [vmem:[#allocation5 + $0x28] sm:$0xff] }
  0x10   :  { %v53_v11 = vld [vmem:[#allocation5 + $0x20] sm:$0xff]  ;;  %v52_v12 = vld [vmem:[#allocation5 + $0x18] sm:$0xff]  ;;  %v51_v13 = vld [vmem:[#allocation5 + $0x10] sm:$0xff] }
  0x11   :  { %67 = vmatpush.msra.mxu0 %v62_v2  ;;  %120 = vmatpush.msra.mxu1 %v62_v2  ;;  %v50_v14 = vld [vmem:[#allocation5 + $0x8] sm:$0xff]  ;;  %v49_v15 = vld [vmem:[#allocation5] sm:$0xff]  ;;  %v47_v16 = vld [vmem:[#allocation2] sm:$0xff] }
  0x12   :  { %v48_v17 = vld [vmem:[#allocation2 + $0x8] sm:$0xff]  ;;  %v139_v18 = vld [vmem:[%s266_s2] ss:$0 sm:$0xff] }
  0x13   :  { %68 = vmatpush.msra.mxu0 %v61_v3  ;;  %121 = vmatpush.msra.mxu1 %v61_v3 }
  0x15   :  { %69 = vmatpush.msra.mxu0 %v60_v4  ;;  %122 = vmatpush.msra.mxu1 %v60_v4 }
  0x17   :  { %70 = vmatpush.msra.mxu0 %v59_v5  ;;  %123 = vmatpush.msra.mxu1 %v59_v5 }
  0x19   :  { %71 = vmatpush.msra.mxu0 %v58_v6  ;;  %124 = vmatpush.msra.mxu1 %v58_v6 }
  0x1b   :  { %72 = vmatpush.msra.mxu0 %v57_v7  ;;  %125 = vmatpush.msra.mxu1 %v57_v7 }
  0x1d   :  { %73 = vmatpush.msra.mxu0 %v56_v8  ;;  %126 = vmatpush.msra.mxu1 %v56_v8 }
  0x1f   :  { %74 = vmatpush.msra.mxu0 %v55_v9  ;;  %127 = vmatpush.msra.mxu1 %v55_v9 }
  0x21   :  { %75 = vmatpush.msra.mxu0 %v54_v10  ;;  %128 = vmatpush.msra.mxu1 %v54_v10 }
  0x23   :  { %76 = vmatpush.msra.mxu0 %v53_v11  ;;  %129 = vmatpush.msra.mxu1 %v53_v11 }
  0x25   :  { %77 = vmatpush.msra.mxu0 %v52_v12  ;;  %130 = vmatpush.msra.mxu1 %v52_v12 }
  0x27   :  { %78 = vmatpush.msra.mxu0 %v51_v13  ;;  %131 = vmatpush.msra.mxu1 %v51_v13 }
  0x29   :  { %79 = vmatpush.msra.mxu0 %v50_v14  ;;  %132 = vmatpush.msra.mxu1 %v50_v14 }
  0x2b   :  { %80 = vmatpush.msra.mxu0 %v49_v15  ;;  %133 = vmatpush.msra.mxu1 %v49_v15 }
  0x2c   :  { %81 = vmatmul.f32.vlgmr.msra.gmra.mxu0 %v47_v16  ;;  %84 = vmatmul.f32.vlgmr.msra.gmra.mxu1 %v48_v17 }
  0xa9   :  { %v82_v19 = vpop.f32.mrf.mxu0  ;;  %v85_v20 = vpop.f32.mrf.mxu1 }
  0xaa   :  { %v89_v21 = vmul.f32 0.17677669, %v82_v19  ;;  %v90_v22 = vmul.f32 0.17677669, %v85_v20 }
  0xac   :  { %v94_v23 = vadd.f32 %v139_v18, %v89_v21  ;;  %v95_v24 = vadd.f32 %v139_v18, %v90_v22 }
  0xae   :  { %96 = vst [vmem:[#allocation7] sm:$0xff] %v94_v23 }
  0xaf   :  { %97 = vst [vmem:[#allocation7 + $0x8] sm:$0xff] %v95_v24 }
  0xb0   :  { %110 = dma.vmem_to_hbm [thread:$0]  %s103_s25, 256, %s105_s28, [#allocation4], %s219_s20, %s219_s20, %s220_s21  }
  0xb1   :  { %216 = dma.done.wait [#allocation4], 256  }
  0xb2   :  { %217 = vsyncadd [#allocation4], 4294967040 }
  0xb3   :  { %115 = vsyncpa [#allocation3], 1 }
  0xb4   :  { %116 = vsyncpa [#allocation6], 1 }
  0xb5   :  { %117 = vsyncpa [#allocation4], 1 }

</bundles_post_ra>
